<compile_context>
chip_gen: v5e
topology: v5e:2x2
jax: 0.10.0
libtpu: 0.0.40
codegen_flags: <defaults>
</compile_context>

<pallas_src>
import jax
import jax.numpy as jnp
from jax.experimental import pallas as pl
from jax.experimental.pallas import tpu as pltpu

HIDDEN = 64
PAD = 128            # lane width; feature dims are zero-padded to this in VMEM
N_LAYERS = 4
DEFAULT_TB = 1024    # batch tile (rows); ~0.5 MiB of VMEM buffers at bf16


def _round_up(x, m):
    return ((x + m - 1) // m) * m


def _choose_tb(bp):
    """Pick a batch tile: big enough to amortize grid-step overhead, but keep
    >= 2 grid steps for larger batches so v7x's two TensorCores both work."""
    tb = min(DEFAULT_TB, bp)
    if bp > 256 and bp // tb < 2:
        tb = _round_up(pl.cdiv(bp, 2), 16)
    return tb


def _make_kernel(F, n_actions):
    def mlp_kernel(x_ref, w_ref, b_ref, o_ref, xp_ref):
        # x_ref : (tb, F)        bf16 activations at natural width
        # w_ref : (4, 128, 128)  bf16 packed weights, layer i is w_ref[i] (in,out)
        # b_ref : (4, 1, 128)    fp32 packed biases
        # o_ref : (tb, n_actions) fp32 narrow output
        # xp_ref: (tb, 128)      bf16 VMEM scratch (lane-padded input slab)
        if F == PAD:
            h = x_ref[...]
        else:
            # Zero every step (cheap VMEM write) so padded lanes are zero even
            # if this grid axis is sharded across cores; then drop x into the
            # first F lanes.
            xp_ref[...] = jnp.zeros_like(xp_ref)
            xp_ref[:, :F] = x_ref[...]
            h = xp_ref[...]

        acc = None
        for i in range(N_LAYERS):
            # bf16 x bf16 on the MXU, fp32 accumulate; bias-add / ReLU in fp32.
            acc = jnp.dot(h, w_ref[i],
                          preferred_element_type=jnp.float32) + b_ref[i]
            if i < N_LAYERS - 1:
                h = jnp.maximum(acc, 0.0).astype(jnp.bfloat16)

        o_ref[...] = acc[:, :n_actions].astype(o_ref.dtype)

    return mlp_kernel


def init_params(key, state_dim, n_actions):
    """Deterministic synthetic init. Weights stored PyTorch-style (out, in)."""
    dims = [(HIDDEN, state_dim), (HIDDEN, HIDDEN), (HIDDEN, HIDDEN),
            (n_actions, HIDDEN)]
    params = []
    for out_d, in_d in dims:
        key, kw, kb = jax.random.split(key, 3)
        bound = 1.0 / jnp.sqrt(in_d)
        w = jax.random.uniform(kw, (out_d, in_d), jnp.float32, -bound, bound)
        b = jax.random.uniform(kb, (out_d,), jnp.float32, -bound, bound)
        params.append((w, b))
    return params


def prepare_params(params):
    """One-time layout: transpose to (in,out), pad to 128 lanes, pack, bf16.

    Returns (w_pack bf16 (4,128,128), b_pack fp32 (4,1,128)).  Zero padding
    keeps the math exact: padded input lanes hit zero weight rows and padded
    output lanes get zero weight columns + zero bias.
    """
    assert len(params) == N_LAYERS
    w_pack = jnp.zeros((N_LAYERS, PAD, PAD), jnp.float32)
    b_pack = jnp.zeros((N_LAYERS, 1, PAD), jnp.float32)
    for i, (w, b) in enumerate(params):
        out_d, in_d = w.shape
        assert in_d <= PAD and out_d <= PAD, "layer dims must fit in 128 lanes"
        w_pack = w_pack.at[i, :in_d, :out_d].set(jnp.transpose(w))
        b_pack = b_pack.at[i, 0, :out_d].set(b)
    return w_pack.astype(jnp.bfloat16), b_pack


def flappy_bird_mlp(x, w_pack, b_pack, n_actions, tb=None):
    """Forward pass.  x: (B, ...) -> (B, n_actions) fp32."""
    B = x.shape[0]
    x2 = x.reshape(B, -1)                       # x.view(x.size(0), -1)
    F = x2.shape[1]
    assert F <= PAD, f"flattened feature dim {F} exceeds {PAD}"
    assert n_actions <= PAD, f"n_actions {n_actions} exceeds {PAD}"

    # bf16 input DMA (the kernel casts to bf16 before every dot anyway).
    x2 = x2.astype(jnp.bfloat16)

    # Pad rows only to the bf16 sublane pack (16), never to a multiple of tb.
    Bp = _round_up(B, 16)
    if Bp != B:
        x2 = jnp.pad(x2, ((0, Bp - B), (0, 0)))

    if tb is None:
        tb = _choose_tb(Bp)
    tb = min(tb, Bp)
    nsteps = pl.cdiv(Bp, tb)                    # last tile may be partial

    out = pl.pallas_call(
        _make_kernel(F, n_actions),
        out_shape=jax.ShapeDtypeStruct((Bp, n_actions), jnp.float32),
        grid=(nsteps,),
        in_specs=[
            pl.BlockSpec((tb, F), lambda i: (i, 0)),                  # bf16 x
            pl.BlockSpec((N_LAYERS, PAD, PAD), lambda i: (0, 0, 0)),  # weights
            pl.BlockSpec((N_LAYERS, 1, PAD), lambda i: (0, 0, 0)),    # biases
        ],
        out_specs=pl.BlockSpec((tb, n_actions), lambda i: (i, 0)),
        scratch_shapes=[pltpu.VMEM((tb, PAD), jnp.bfloat16)],
        compiler_params=pltpu.CompilerParams(
            dimension_semantics=("parallel",)),
    )(x2, w_pack, b_pack)

    return out[:B]


def reference_packed(x, w_pack, b_pack, n_actions):
    """Plain-JAX reference using the same packed bf16 layout as the kernel."""
    B = x.shape[0]
    h = x.reshape(B, -1).astype(jnp.bfloat16)
    h = jnp.pad(h, ((0, 0), (0, PAD - h.shape[1])))
    acc = None
    for i in range(N_LAYERS):
        acc = jnp.dot(h, w_pack[i],
                      preferred_element_type=jnp.float32) + b_pack[i]
        if i < N_LAYERS - 1:
            h = jnp.maximum(acc, 0.0).astype(jnp.bfloat16)
    return acc[:, :n_actions]


def reference_fp32(x, params):
    """Full-precision reference of the original PyTorch module."""
    h = x.reshape(x.shape[0], -1).astype(jnp.float32)
    for i, (w, bias) in enumerate(params):
        h = h @ w.T + bias
        if i < len(params) - 1:
            h = jnp.maximum(h, 0.0)
    return h


if __name__ == "__main__":
    key = jax.random.PRNGKey(0)
    batch, state_dim, n_actions = 2, 8, 2

    k_x, k_p = jax.random.split(key)
    x = jax.random.normal(k_x, (batch, state_dim), jnp.float32)
    params = init_params(k_p, state_dim, n_actions)

    # One-time parameter layout (hoisted out of the forward path).
    w_pack, b_pack = prepare_params(params)

    out = flappy_bird_mlp(x, w_pack, b_pack, n_actions)
    out = jax.block_until_ready(out)
    assert out.shape == (batch, n_actions)

    # Exact-layout reference (same bf16 casts, fp32 accumulate).
    ref_packed = reference_packed(x, w_pack, b_pack, n_actions)
    assert jnp.allclose(out, ref_packed, atol=2e-3, rtol=2e-3), \
        "mismatch vs packed bf16 reference"

    # Original-module fp32 semantics, allowing bf16 weight/activation rounding.
    ref32 = reference_fp32(x, params)
    assert jnp.allclose(out, ref32, atol=5e-2, rtol=5e-2), \
        "mismatch vs fp32 reference"

    print("KERNEL_OK")
</pallas_src>

<mosaic_0001>
module attributes {stable_mosaic.version = 11 : i64} {
  func.func @mlp_kernel(%arg0: i32, %arg1: memref<16x8xbf16, #tpu.memory_space<vmem>>, %arg2: memref<4x128x128xbf16, #tpu.memory_space<vmem>>, %arg3: memref<4x1x128xf32, #tpu.memory_space<vmem>>, %arg4: memref<16x2xf32, #tpu.memory_space<vmem>>, %arg5: memref<16x128xbf16, #tpu.memory_space<vmem>>) attributes {dimension_semantics = [#tpu.dimension_semantics<parallel>], iteration_bounds = array<i64: 1>, scalar_prefetch = 0 : i64, scratch_operands = 1 : i64, tpu.core_type = #tpu.core_type<tc>, window_params = [{transform_indices = @transform_0, window_bounds = array<i64: 16, 8>}, {pipeline_mode = #tpu.pipeline_mode<synchronous>, transform_indices = @transform_1, window_bounds = array<i64: 4, 128, 128>}, {pipeline_mode = #tpu.pipeline_mode<synchronous>, transform_indices = @transform_2, window_bounds = array<i64: 4, 1, 128>}, {transform_indices = @transform_3, window_bounds = array<i64: 16, 2>}]} {
    %cst = arith.constant 0.000000e+00 : bf16
    %0 = vector.broadcast %cst : bf16 to vector<16x128xbf16>
    %c0 = arith.constant 0 : index
    %c0_0 = arith.constant 0 : index
    %1 = vector.load %arg5[%c0, %c0_0] : memref<16x128xbf16, #tpu.memory_space<vmem>>, vector<16x128xbf16>
    tpu.vector_store %arg5[%c0, %c0_0], %0 {strides = array<i32>} : memref<16x128xbf16, #tpu.memory_space<vmem>>, vector<16x128xbf16>,
    %c0_1 = arith.constant 0 : index
    %c0_2 = arith.constant 0 : index
    %2 = vector.load %arg1[%c0_1, %c0_2] : memref<16x8xbf16, #tpu.memory_space<vmem>>, vector<16x8xbf16>
    %c0_3 = arith.constant 0 : index
    %c0_4 = arith.constant 0 : index
    %3 = vector.load %arg5[%c0_3, %c0_4] : memref<16x128xbf16, #tpu.memory_space<vmem>>, vector<16x8xbf16>
    tpu.vector_store %arg5[%c0_3, %c0_4], %2 {strides = array<i32>} : memref<16x128xbf16, #tpu.memory_space<vmem>>, vector<16x8xbf16>,
    %c0_5 = arith.constant 0 : index
    %c0_6 = arith.constant 0 : index
    %4 = vector.load %arg5[%c0_5, %c0_6] : memref<16x128xbf16, #tpu.memory_space<vmem>>, vector<16x128xbf16>
    %c0_7 = arith.constant 0 : index
    %c0_8 = arith.constant 0 : index
    %c0_9 = arith.constant 0 : index
    %5 = vector.load %arg2[%c0_7, %c0_8, %c0_9] : memref<4x128x128xbf16, #tpu.memory_space<vmem>>, vector<1x128x128xbf16>
    %6 = vector.shape_cast %5 : vector<1x128x128xbf16> to vector<128x128xbf16>
    %cst_10 = arith.constant dense<0.000000e+00> : vector<16x128xf32>
    %7 = tpu.matmul %4, %6, %cst_10 {dimension_numbers = #tpu.dot_dimension_numbers<[1], [0], [0], [1], [0, 0, 1, 1], [], []>} : vector<16x128xbf16>, vector<128x128xbf16>, vector<16x128xf32> -> vector<16x128xf32>
    %c0_11 = arith.constant 0 : index
    %c0_12 = arith.constant 0 : index
    %c0_13 = arith.constant 0 : index
    %8 = vector.load %arg3[%c0_11, %c0_12, %c0_13] : memref<4x1x128xf32, #tpu.memory_space<vmem>>, vector<1x1x128xf32>
    %9 = vector.shape_cast %8 : vector<1x1x128xf32> to vector<1x128xf32>
    %10 = vector.broadcast %9 : vector<1x128xf32> to vector<16x128xf32>
    %11 = arith.addf %7, %10 : vector<16x128xf32>
    %cst_14 = arith.constant 0.000000e+00 : f32
    %12 = vector.broadcast %cst_14 : f32 to vector<16x128xf32>
    %13 = arith.maximumf %11, %12 : vector<16x128xf32>
    %14 = arith.truncf %13 : vector<16x128xf32> to vector<16x128xbf16>
    %c1 = arith.constant 1 : index
    %c0_15 = arith.constant 0 : index
    %c0_16 = arith.constant 0 : index
    %15 = vector.load %arg2[%c1, %c0_15, %c0_16] : memref<4x128x128xbf16, #tpu.memory_space<vmem>>, vector<1x128x128xbf16>
    %16 = vector.shape_cast %15 : vector<1x128x128xbf16> to vector<128x128xbf16>
    %cst_17 = arith.constant dense<0.000000e+00> : vector<16x128xf32>
    %17 = tpu.matmul %14, %16, %cst_17 {dimension_numbers = #tpu.dot_dimension_numbers<[1], [0], [0], [1], [0, 0, 1, 1], [], []>} : vector<16x128xbf16>, vector<128x128xbf16>, vector<16x128xf32> -> vector<16x128xf32>
    %c1_18 = arith.constant 1 : index
    %c0_19 = arith.constant 0 : index
    %c0_20 = arith.constant 0 : index
    %18 = vector.load %arg3[%c1_18, %c0_19, %c0_20] : memref<4x1x128xf32, #tpu.memory_space<vmem>>, vector<1x1x128xf32>
    %19 = vector.shape_cast %18 : vector<1x1x128xf32> to vector<1x128xf32>
    %20 = vector.broadcast %19 : vector<1x128xf32> to vector<16x128xf32>
    %21 = arith.addf %17, %20 : vector<16x128xf32>
    %cst_21 = arith.constant 0.000000e+00 : f32
    %22 = vector.broadcast %cst_21 : f32 to vector<16x128xf32>
    %23 = arith.maximumf %21, %22 : vector<16x128xf32>
    %24 = arith.truncf %23 : vector<16x128xf32> to vector<16x128xbf16>
    %c2 = arith.constant 2 : index
    %c0_22 = arith.constant 0 : index
    %c0_23 = arith.constant 0 : index
    %25 = vector.load %arg2[%c2, %c0_22, %c0_23] : memref<4x128x128xbf16, #tpu.memory_space<vmem>>, vector<1x128x128xbf16>
    %26 = vector.shape_cast %25 : vector<1x128x128xbf16> to vector<128x128xbf16>
    %cst_24 = arith.constant dense<0.000000e+00> : vector<16x128xf32>
    %27 = tpu.matmul %24, %26, %cst_24 {dimension_numbers = #tpu.dot_dimension_numbers<[1], [0], [0], [1], [0, 0, 1, 1], [], []>} : vector<16x128xbf16>, vector<128x128xbf16>, vector<16x128xf32> -> vector<16x128xf32>
    %c2_25 = arith.constant 2 : index
    %c0_26 = arith.constant 0 : index
    %c0_27 = arith.constant 0 : index
    %28 = vector.load %arg3[%c2_25, %c0_26, %c0_27] : memref<4x1x128xf32, #tpu.memory_space<vmem>>, vector<1x1x128xf32>
    %29 = vector.shape_cast %28 : vector<1x1x128xf32> to vector<1x128xf32>
    %30 = vector.broadcast %29 : vector<1x128xf32> to vector<16x128xf32>
    %31 = arith.addf %27, %30 : vector<16x128xf32>
    %cst_28 = arith.constant 0.000000e+00 : f32
    %32 = vector.broadcast %cst_28 : f32 to vector<16x128xf32>
    %33 = arith.maximumf %31, %32 : vector<16x128xf32>
    %34 = arith.truncf %33 : vector<16x128xf32> to vector<16x128xbf16>
    %c3 = arith.constant 3 : index
    %c0_29 = arith.constant 0 : index
    %c0_30 = arith.constant 0 : index
    %35 = vector.load %arg2[%c3, %c0_29, %c0_30] : memref<4x128x128xbf16, #tpu.memory_space<vmem>>, vector<1x128x128xbf16>
    %36 = vector.shape_cast %35 : vector<1x128x128xbf16> to vector<128x128xbf16>
    %cst_31 = arith.constant dense<0.000000e+00> : vector<16x128xf32>
    %37 = tpu.matmul %34, %36, %cst_31 {dimension_numbers = #tpu.dot_dimension_numbers<[1], [0], [0], [1], [0, 0, 1, 1], [], []>} : vector<16x128xbf16>, vector<128x128xbf16>, vector<16x128xf32> -> vector<16x128xf32>
    %c3_32 = arith.constant 3 : index
    %c0_33 = arith.constant 0 : index
    %c0_34 = arith.constant 0 : index
    %38 = vector.load %arg3[%c3_32, %c0_33, %c0_34] : memref<4x1x128xf32, #tpu.memory_space<vmem>>, vector<1x1x128xf32>
    %39 = vector.shape_cast %38 : vector<1x1x128xf32> to vector<1x128xf32>
    %40 = vector.broadcast %39 : vector<1x128xf32> to vector<16x128xf32>
    %41 = arith.addf %37, %40 : vector<16x128xf32>
    %42 = vector.extract_strided_slice %41 {offsets = [0, 0], sizes = [16, 2], strides = [1, 1]} : vector<16x128xf32> to vector<16x2xf32>
    %c0_35 = arith.constant 0 : index
    %c0_36 = arith.constant 0 : index
    %43 = vector.load %arg4[%c0_35, %c0_36] : memref<16x2xf32, #tpu.memory_space<vmem>>, vector<16x2xf32>
    tpu.vector_store %arg4[%c0_35, %c0_36], %42 {strides = array<i32>} : memref<16x2xf32, #tpu.memory_space<vmem>>, vector<16x2xf32>,
    return
  }
  func.func @transform_0(%arg0: i32) -> (i32, i32) {
    %c0_i32 = arith.constant 0 : i32
    %c0_i32_0 = arith.constant 0 : i32
    return %arg0, %c0_i32 : i32, i32
  }
  func.func @transform_1(%arg0: i32) -> (i32, i32, i32) {
    %c0_i32 = arith.constant 0 : i32
    %c0_i32_0 = arith.constant 0 : i32
    %c0_i32_1 = arith.constant 0 : i32
    %c0_i32_2 = arith.constant 0 : i32
    return %c0_i32, %c0_i32_0, %c0_i32_1 : i32, i32, i32
  }
  func.func @transform_2(%arg0: i32) -> (i32, i32, i32) {
    %c0_i32 = arith.constant 0 : i32
    %c0_i32_0 = arith.constant 0 : i32
    %c0_i32_1 = arith.constant 0 : i32
    %c0_i32_2 = arith.constant 0 : i32
    return %c0_i32, %c0_i32_0, %c0_i32_1 : i32, i32, i32
  }
  func.func @transform_3(%arg0: i32) -> (i32, i32) {
    %c0_i32 = arith.constant 0 : i32
    %c0_i32_0 = arith.constant 0 : i32
    return %arg0, %c0_i32 : i32, i32
  }
}

</mosaic_0001>

<bundles_post_ra>
// kernel: tpu_custom_call.1
= control target key start
LH: loop header
LB: loop body
LE: loop exit
PB: predicated region body
PF: predicated region fallthrough
CT: control target
= control target key end

     0   :  { %8 = vsyncpa [#allocation4], 0  ;;  %s599_s15 = smov [#allocation3]   ;;  %s600_s17 = smov 64   ;;  %s650_s0 = inlined_call_operand.vmem [shape: bf16[16,8], index: 0, kind: input, shape index: {}]   ;;  %s651_s1 = inlined_call_operand.hbm [shape: bf16[4,128,128], index: 1, kind: input, shape index: {}]   ;;  %s652_s2 = inlined_call_operand.vmem [shape: f32[4,1,128], index: 2, kind: input, shape index: {}]   ;;  %s653_s3 = inlined_call_operand.vmem [shape: f32[16,2], index: 3, kind: output, shape index: {}]  }
   0x1   :  { %s15_s14 = sshll.u32 %s651_s1, 4  ;;  %s17_s16 = sshll.u32 %s599_s15, 4  ;;  %s16_s14 = int_to_ptr.hbm [resolvable:$true] %s15_s14  ;;  %s18_s16 = int_to_ptr.vmem [resolvable:$true] %s17_s16 }
   0x2   :  { %s601_s18 = smov 4  }
   0x3   :  { %23 = dma.hbm_to_vmem [thread:$0]  %s16_s14, 4096, %s18_s16, [#allocation4], %s600_s17, %s600_s17, %s601_s18  }
   0x4   :  { %597 = dma.done.wait [#allocation4], 4096  }
   0x5   :  { %598 = vsyncadd [#allocation4], 4294963200  ;;  %v602_v0 = vmov 0   ;;  %v540_v1 = vld [vmem:[#allocation3 + $0x38] sm:$0xff]  ;;  %vm35_vm0 = vcmask 60416   ;;  %v539_v2 = vld [vmem:[#allocation3 + $0x30] sm:$0xff] }
   0x6   :  { %31 = vst [vmem:[#allocation2] sm:$0xf] %v602_v0  ;;  %114 = vmatpush.bf16.msra.mxu0 %v540_v1  ;;  %v33_v3 = vld [vmem:[%s650_s0] sm:$0xf]  ;;  %v34_v4 = vld [vmem:[%s650_s0 + $0x4] sm:$0xf] }
   0x7   :  { %32 = vst [vmem:[#allocation2 + $0x4] sm:$0xf] %v602_v0  ;;  %v548_v5 = vld [vmem:[#allocation3 + $0x78] sm:$0xff]  ;;  %v547_v6 = vld [vmem:[#allocation3 + $0x70] sm:$0xff]  ;;  %v538_v7 = vld [vmem:[#allocation3 + $0x28] sm:$0xff]  ;;  %vm389_vm1 = vcmask 15360  }
   0x8   :  { %36 = vst.msk [vmem:[#allocation2] sm:$0xf] %vm35_vm0, %v33_v3  ;;  %201 = vmatpush.bf16.msra.mxu1 %v548_v5  ;;  %v546_v8 = vld [vmem:[#allocation3 + $0x68] sm:$0xff]  ;;  %v537_v9 = vld [vmem:[#allocation3 + $0x20] sm:$0xff]  ;;  %v536_v11 = vld [vmem:[#allocation3 + $0x18] sm:$0xff] }
   0x9   :  { %37 = vst.msk [vmem:[#allocation2 + $0x4] sm:$0xf] %vm35_vm0, %v34_v4  ;;  %v545_v10 = vld [vmem:[#allocation3 + $0x60] sm:$0xff]  ;;  %v535_v12 = vld [vmem:[#allocation3 + $0x10] sm:$0xff]  ;;  %v534_v13 = vld [vmem:[#allocation3 + $0x8] sm:$0xff] }
   0xa   :  { %115 = vmatpush.bf16.msra.mxu0 %v539_v2  ;;  %v533_v14 = vld [vmem:[#allocation3] sm:$0xff]  ;;  %v544_v16 = vld [vmem:[#allocation3 + $0x58] sm:$0xff]  ;;  %v543_v17 = vld [vmem:[#allocation3 + $0x50] sm:$0xff] }
   0xb   :  { %v542_v18 = vld [vmem:[#allocation3 + $0x48] sm:$0xff]  ;;  %v541_v19 = vld [vmem:[#allocation3 + $0x40] sm:$0xff]  ;;  %v556_v20 = vld [vmem:[#allocation3 + $0xb8] sm:$0xff] }
   0xc   :  { %202 = vmatpush.bf16.msra.mxu1 %v547_v6  ;;  %288 = vmatpush.bf16.msra.mxu2 %v556_v20  ;;  %v555_v21 = vld [vmem:[#allocation3 + $0xb0] sm:$0xff]  ;;  %v554_v22 = vld [vmem:[#allocation3 + $0xa8] sm:$0xff]  ;;  %v553_v23 = vld [vmem:[#allocation3 + $0xa0] sm:$0xff] }
   0xd   :  { %v569_v25 = vld [vmem:[%s652_s2] ss:$0 sm:$0xff]  ;;  %v551_v33 = vld [vmem:[#allocation3 + $0x90] sm:$0xff]  ;;  %v550_v34 = vld [vmem:[#allocation3 + $0x88] sm:$0xff] }
   0xe   :  { %116 = vmatpush.bf16.msra.mxu0 %v538_v7  ;;  %v552_v32 = vld [vmem:[#allocation3 + $0x98] sm:$0xff]  ;;  %v549_v35 = vld [vmem:[#allocation3 + $0x80] sm:$0xff]  ;;  %v563_v37 = vld [vmem:[#allocation3 + $0xf0] sm:$0xff] }
   0xf   :  { %v564_v36 = vld [vmem:[#allocation3 + $0xf8] sm:$0xff]  ;;  %v562_v38 = vld [vmem:[#allocation3 + $0xe8] sm:$0xff]  ;;  %v561_v39 = vld [vmem:[#allocation3 + $0xe0] sm:$0xff] }
  0x10   :  { %203 = vmatpush.bf16.msra.mxu1 %v546_v8  ;;  %v532_v15 = vld [vmem:[#allocation2] sm:$0xff]  ;;  %289 = vmatpush.bf16.msra.mxu2 %v555_v21  ;;  %v559_v49 = vld [vmem:[#allocation3 + $0xd0] sm:$0xff]  ;;  %v558_v50 = vld [vmem:[#allocation3 + $0xc8] sm:$0xff] }
  0x11   :  { %375 = vmatpush.bf16.msra.mxu3 %v564_v36  ;;  %v570_v41 = vld [vmem:[%s652_s2 + $0x1] ss:$0 sm:$0xff]  ;;  %v557_v51 = vld [vmem:[#allocation3 + $0xc0] sm:$0xff]  ;;  %v571_v53 = vld [vmem:[%s652_s2 + $0x2] ss:$0 sm:$0xff] }
  0x12   :  { %117 = vmatpush.bf16.msra.mxu0 %v537_v9  ;;  %v560_v48 = vld [vmem:[#allocation3 + $0xd8] sm:$0xff] }
  0x13   :  { %v572_v60 = vld [vmem:[%s652_s2 + $0x3] ss:$0 sm:$0xff] }
  0x14   :  { %204 = vmatpush.bf16.msra.mxu1 %v545_v10  ;;  %290 = vmatpush.bf16.msra.mxu2 %v554_v22 }
  0x15   :  { %376 = vmatpush.bf16.msra.mxu3 %v563_v37 }
  0x16   :  { %118 = vmatpush.bf16.msra.mxu0 %v536_v11 }
  0x18   :  { %205 = vmatpush.bf16.msra.mxu1 %v544_v16  ;;  %291 = vmatpush.bf16.msra.mxu2 %v553_v23 }
  0x19   :  { %377 = vmatpush.bf16.msra.mxu3 %v562_v38 }
  0x1a   :  { %119 = vmatpush.bf16.msra.mxu0 %v535_v12 }
  0x1c   :  { %206 = vmatpush.bf16.msra.mxu1 %v543_v17  ;;  %292 = vmatpush.bf16.msra.mxu2 %v552_v32 }
  0x1d   :  { %378 = vmatpush.bf16.msra.mxu3 %v561_v39 }
  0x1e   :  { %120 = vmatpush.bf16.msra.mxu0 %v534_v13 }
  0x20   :  { %207 = vmatpush.bf16.msra.mxu1 %v542_v18  ;;  %293 = vmatpush.bf16.msra.mxu2 %v551_v33 }
  0x21   :  { %379 = vmatpush.bf16.msra.mxu3 %v560_v48 }
  0x22   :  { %121 = vmatpush.bf16.msra.mxu0 %v533_v14 }
  0x24   :  { %208 = vmatpush.bf16.msra.mxu1 %v541_v19  ;;  %294 = vmatpush.bf16.msra.mxu2 %v550_v34 }
  0x25   :  { %122 = vmatmul.bf16.vlgmr.msra.gmra.mxu0 %v532_v15  ;;  %380 = vmatpush.bf16.msra.mxu3 %v559_v49 }
  0x28   :  { %295 = vmatpush.bf16.msra.mxu2 %v549_v35 }
  0x29   :  { %381 = vmatpush.bf16.msra.mxu3 %v558_v50 }
  0x2d   :  { %382 = vmatpush.bf16.msra.mxu3 %v557_v51 }
  0xa2   :  { %v123_v24 = vpop.f32.mrf.mxu0 }
  0xa3   :  { %v124_v26 = vadd.f32 %v569_v25, %v123_v24 }
  0xa5   :  { %v128_v29 = vmax.f32 %v124_v26, 0.0 }
  0xaa   :  { %v125_v27 = vpop.f32.mrf.mxu0 }
  0xab   :  { %v126_v28 = vadd.f32 %v569_v25, %v125_v27 }
  0xad   :  { %v129_v30 = vmax.f32 %v126_v28, 0.0 }
  0xaf   :  { %v130_v31 = vpack.c.bf16 %v129_v30, %v128_v29 }
  0xb1   :  { %209 = vmatmul.bf16.vlgmr.msra.gmra.mxu1 %v130_v31 }
 0x12e   :  { %v210_v40 = vpop.f32.mrf.mxu1 }
 0x12f   :  { %v211_v42 = vadd.f32 %v570_v41, %v210_v40 }
 0x131   :  { %v215_v45 = vmax.f32 %v211_v42, 0.0 }
 0x136   :  { %v212_v43 = vpop.f32.mrf.mxu1 }
 0x137   :  { %v213_v44 = vadd.f32 %v570_v41, %v212_v43 }
 0x139   :  { %v216_v46 = vmax.f32 %v213_v44, 0.0 }
 0x13b   :  { %v217_v47 = vpack.c.bf16 %v216_v46, %v215_v45 }
 0x13d   :  { %296 = vmatmul.bf16.vlgmr.msra.gmra.mxu2 %v217_v47 }
 0x1c0   :  { %v297_v52 = vpop.f32.mrf.mxu2 }
 0x1c1   :  { %v298_v54 = vadd.f32 %v571_v53, %v297_v52 }
 0x1c3   :  { %v302_v57 = vmax.f32 %v298_v54, 0.0 }
 0x1c8   :  { %v299_v55 = vpop.f32.mrf.mxu2 }
 0x1c9   :  { %v300_v56 = vadd.f32 %v571_v53, %v299_v55 }
 0x1cb   :  { %v303_v58 = vmax.f32 %v300_v56, 0.0 }
 0x1cd   :  { %v304_v59 = vpack.c.bf16 %v303_v58, %v302_v57 }
 0x1cf   :  { %383 = vmatmul.bf16.vlgmr.msra.gmra.mxu3 %v304_v59 }
 0x252   :  { %v384_v61 = vpop.f32.mrf.mxu3 }
 0x253   :  { %v385_v62 = vadd.f32 %v572_v60, %v384_v61 }
 0x255   :  { %390 = vst.msk [vmem:[%s653_s3] sm:$0xff] %vm389_vm1, %v385_v62 }
 0x25a   :  { %v386_v63 = vpop.f32.mrf.mxu3 }
 0x25b   :  { %v387_v0 = vadd.f32 %v572_v60, %v386_v63 }
 0x25d   :  { %391 = vst.msk [vmem:[%s653_s3 + $0x8] sm:$0xff] %vm389_vm1, %v387_v0 }
 0x25e   :  { %396 = vsyncpa [#allocation4], 1 }

</bundles_post_ra>
